<compile_context>
chip_gen: v6e
topology: v6e:2x2x1
jax: 0.10.0
libtpu: 0.0.40
codegen_flags: <defaults>
</compile_context>

<pallas_src>
import functools

import jax
import jax.numpy as jnp
from jax.experimental import pallas as pl
from jax.experimental.pallas import tpu as pltpu


def _round_up(x: int, m: int) -> int:
    return ((x + m - 1) // m) * m


def a3c_actor_kernel(obs_ref,
                     w1_ref, b1_ref,
                     w2_ref, b2_ref,
                     wh_ref, bh_ref,
                     out_ref,
                     *, softplus_beta: float, act_dim: int):
    """One batch tile: 2-layer ReLU trunk + fused (mean||std||pad) head, lane-dense output."""
    x = obs_ref[...]                                                          # [TB, obs_dim]

    # Trunk (lane-padded hidden width, MXU matmuls with f32 accumulation).
    h1 = jnp.dot(x, w1_ref[...], preferred_element_type=jnp.float32) + b1_ref[...]
    h1 = jnp.maximum(h1, 0.0)
    h2 = jnp.dot(h1, w2_ref[...], preferred_element_type=jnp.float32) + b2_ref[...]
    h2 = jnp.maximum(h2, 0.0)

    # Fused head: cols [0, act_dim) = mean, [act_dim, 2*act_dim) = pre-softplus std,
    # [2*act_dim, n_out_pad) = zero padding (stays zero; sliced off by the wrapper).
    z = jnp.dot(h2, wh_ref[...], preferred_element_type=jnp.float32) + bh_ref[...]

    # Softplus(beta=act_dim, threshold=20) exactly as nn.Softplus:
    #   softplus(x) = x                              if beta*x > 20
    #               = (1/beta) * log1p(exp(beta*x))  otherwise
    bz = softplus_beta * z
    sp = jnp.where(bz > 20.0, z,
                   (1.0 / softplus_beta) * jnp.log1p(jnp.exp(jnp.minimum(bz, 20.0))))

    # Apply softplus only on the std lane range (lane mask; no narrow slice/concat).
    col = jax.lax.broadcasted_iota(jnp.int32, z.shape, 1)
    is_std = jnp.logical_and(col >= act_dim, col < 2 * act_dim)
    out = jnp.where(is_std, sp, z)
    out_ref[...] = out.astype(out_ref.dtype)


def prepare_params(params, act_dim: int):
    """One-time prep: fuse mean/std heads, pad hidden and head-output (lane) dims to 128 multiples."""
    w1, b1, w2, b2, wm, bm, ws, bs = params
    H = w1.shape[1]
    H_pad = _round_up(H, 128)
    dh = H_pad - H
    n_out = 2 * act_dim
    n_out_pad = _round_up(max(n_out, 128), 128)
    do = n_out_pad - n_out

    w1p = jnp.pad(w1, ((0, 0), (0, dh)))                                      # [obs_dim, H_pad]
    b1p = jnp.pad(b1, ((0, 0), (0, dh)))                                      # [1, H_pad]
    w2p = jnp.pad(w2, ((0, dh), (0, dh)))                                     # [H_pad, H_pad]
    b2p = jnp.pad(b2, ((0, 0), (0, dh)))                                      # [1, H_pad]
    whp = jnp.pad(jnp.concatenate([wm, ws], axis=1), ((0, dh), (0, do)))      # [H_pad, n_out_pad]
    bhp = jnp.pad(jnp.concatenate([bm, bs], axis=1), ((0, 0), (0, do)))       # [1, n_out_pad]
    return (w1p, b1p, w2p, b2p, whp, bhp)


def a3c_actor_forward(obs, prepped_params, act_dim: int, tile_b: int = 512):
    """Returns (action_mean, action_std) — the Normal distribution parameters."""
    w1p, b1p, w2p, b2p, whp, bhp = prepped_params
    B, obs_dim = obs.shape
    H_pad = w1p.shape[1]
    n_out_pad = whp.shape[1]

    # Batch tiling: full batch if it fits one tile, otherwise 512-row tiles (multiple of 8).
    if B <= tile_b:
        TB = B
        B_pad = B
    else:
        TB = tile_b
        B_pad = _round_up(B, TB)
    obs_p = obs if B_pad == B else jnp.pad(obs, ((0, B_pad - B), (0, 0)))
    grid = (B_pad // TB,)

    kernel = functools.partial(a3c_actor_kernel,
                               softplus_beta=float(act_dim), act_dim=act_dim)

    param_elems = sum(int(p.size) for p in prepped_params)
    cost = pl.CostEstimate(
        flops=2 * B_pad * (obs_dim * H_pad + H_pad * H_pad + H_pad * n_out_pad),
        transcendentals=2 * B_pad * n_out_pad,                 # exp + log1p per head lane
        bytes_accessed=4 * (B_pad * obs_dim + param_elems + B_pad * n_out_pad),
    )

    const_spec = lambda shape: pl.BlockSpec(shape, lambda i: (0, 0))  # VMEM-resident params

    out = pl.pallas_call(
        kernel,
        out_shape=jax.ShapeDtypeStruct((B_pad, n_out_pad), jnp.float32),
        grid_spec=pltpu.PrefetchScalarGridSpec(
            num_scalar_prefetch=0,
            grid=grid,
            in_specs=[
                pl.BlockSpec((TB, obs_dim), lambda i: (i, 0)),   # streamed, double-buffered
                const_spec(w1p.shape), const_spec(b1p.shape),
                const_spec(w2p.shape), const_spec(b2p.shape),
                const_spec(whp.shape), const_spec(bhp.shape),
            ],
            out_specs=pl.BlockSpec((TB, n_out_pad), lambda i: (i, 0)),
        ),
        compiler_params=pltpu.CompilerParams(
            dimension_semantics=("parallel",),                   # megacore sharding on v7x
        ),
        cost_estimate=cost,
    )(obs_p, w1p, b1p, w2p, b2p, whp, bhp)

    out = out[:B]
    return out[:, :act_dim], out[:, act_dim:2 * act_dim]


def init_params(key, obs_dim, hidden_sizes, act_dim):
    """Deterministic synthetic parameters (PyTorch-Linear-like uniform init), weights stored [in, out]."""
    params = []
    dims = [obs_dim] + list(hidden_sizes)
    keys = jax.random.split(key, 2 * (len(hidden_sizes) + 2))
    ki = 0
    for d_in, d_out in zip(dims[:-1], dims[1:]):
        bound = 1.0 / jnp.sqrt(d_in)
        w = jax.random.uniform(keys[ki], (d_in, d_out), jnp.float32, -bound, bound); ki += 1
        b = jax.random.uniform(keys[ki], (1, d_out), jnp.float32, -bound, bound); ki += 1
        params += [w, b]
    d_in = dims[-1]
    bound = 1.0 / jnp.sqrt(d_in)
    for _ in range(2):                                   # mean head, std head
        w = jax.random.uniform(keys[ki], (d_in, act_dim), jnp.float32, -bound, bound); ki += 1
        b = jax.random.uniform(keys[ki], (1, act_dim), jnp.float32, -bound, bound); ki += 1
        params += [w, b]
    return tuple(params)


def reference_forward(obs, params, act_dim):
    """Pure-JAX reference (unfused, unpadded) for verification."""
    w1, b1, w2, b2, wm, bm, ws, bs = params
    h = jnp.maximum(obs @ w1 + b1, 0.0)
    h = jnp.maximum(h @ w2 + b2, 0.0)
    mean = h @ wm + bm
    z = h @ ws + bs
    beta = float(act_dim)
    bz = beta * z
    std = jnp.where(bz > 20.0, z, (1.0 / beta) * jnp.log1p(jnp.exp(jnp.minimum(bz, 20.0))))
    return mean, std


if __name__ == "__main__":
    # Small shapes consistent with the module: flattened Box observation, 2-layer MLP trunk, Box action.
    B = 8              # batch (vectorized envs)
    OBS_DIM = 16       # build_flattener(obs_space).size
    HIDDEN = (32, 32)  # args.act_hidden_size
    ACT_DIM = 4        # act_space.shape[0]

    key = jax.random.PRNGKey(0)
    k_obs, k_params = jax.random.split(key)
    obs = jax.random.normal(k_obs, (B, OBS_DIM), jnp.float32)
    params = init_params(k_params, OBS_DIM, HIDDEN, ACT_DIM)
    prepped = prepare_params(params, ACT_DIM)

    mean, std = a3c_actor_forward(obs, prepped, ACT_DIM)
    mean = jax.block_until_ready(mean)
    std = jax.block_until_ready(std)

    ref_mean, ref_std = reference_forward(obs, params, ACT_DIM)
    assert mean.shape == (B, ACT_DIM) and std.shape == (B, ACT_DIM), "bad output shape"
    assert jnp.allclose(mean, ref_mean, atol=1e-5, rtol=1e-5), "mean mismatch"
    assert jnp.allclose(std, ref_std, atol=1e-5, rtol=1e-5), "std mismatch"
    assert bool(jnp.all(std > 0)), "softplus std must be positive"

    print("KERNEL_OK")
</pallas_src>

<mosaic_0001>
module attributes {stable_mosaic.version = 11 : i64} {
  func.func @a3c_actor_kernel(%arg0: i32, %arg1: memref<8x16xf32, #tpu.memory_space<vmem>>, %arg2: memref<16x128xf32, #tpu.memory_space<vmem>>, %arg3: memref<1x128xf32, #tpu.memory_space<vmem>>, %arg4: memref<128x128xf32, #tpu.memory_space<vmem>>, %arg5: memref<1x128xf32, #tpu.memory_space<vmem>>, %arg6: memref<128x128xf32, #tpu.memory_space<vmem>>, %arg7: memref<1x128xf32, #tpu.memory_space<vmem>>, %arg8: memref<8x128xf32, #tpu.memory_space<vmem>>) attributes {dimension_semantics = [#tpu.dimension_semantics<parallel>], iteration_bounds = array<i64: 1>, scalar_prefetch = 0 : i64, scratch_operands = 0 : i64, tpu.core_type = #tpu.core_type<tc>, window_params = [{transform_indices = @transform_0, window_bounds = array<i64: 8, 16>}, {pipeline_mode = #tpu.pipeline_mode<synchronous>, transform_indices = @transform_1, window_bounds = array<i64: 16, 128>}, {pipeline_mode = #tpu.pipeline_mode<synchronous>, transform_indices = @transform_2, window_bounds = array<i64: 1, 128>}, {pipeline_mode = #tpu.pipeline_mode<synchronous>, transform_indices = @transform_3, window_bounds = array<i64: 128, 128>}, {pipeline_mode = #tpu.pipeline_mode<synchronous>, transform_indices = @transform_4, window_bounds = array<i64: 1, 128>}, {pipeline_mode = #tpu.pipeline_mode<synchronous>, transform_indices = @transform_5, window_bounds = array<i64: 128, 128>}, {pipeline_mode = #tpu.pipeline_mode<synchronous>, transform_indices = @transform_6, window_bounds = array<i64: 1, 128>}, {transform_indices = @transform_7, window_bounds = array<i64: 8, 128>}]} {
    %c0 = arith.constant 0 : index
    %c0_0 = arith.constant 0 : index
    %0 = vector.load %arg1[%c0, %c0_0] : memref<8x16xf32, #tpu.memory_space<vmem>>, vector<8x16xf32>
    %c0_1 = arith.constant 0 : index
    %c0_2 = arith.constant 0 : index
    %1 = vector.load %arg2[%c0_1, %c0_2] : memref<16x128xf32, #tpu.memory_space<vmem>>, vector<16x128xf32>
    %cst = arith.constant dense<0.000000e+00> : vector<8x128xf32>
    %2 = tpu.matmul %0, %1, %cst {dimension_numbers = #tpu.dot_dimension_numbers<[1], [0], [0], [1], [0, 0, 1, 1], [], []>} : vector<8x16xf32>, vector<16x128xf32>, vector<8x128xf32> -> vector<8x128xf32>
    %c0_3 = arith.constant 0 : index
    %c0_4 = arith.constant 0 : index
    %3 = vector.load %arg3[%c0_3, %c0_4] : memref<1x128xf32, #tpu.memory_space<vmem>>, vector<1x128xf32>
    %4 = vector.broadcast %3 : vector<1x128xf32> to vector<8x128xf32>
    %5 = arith.addf %2, %4 : vector<8x128xf32>
    %cst_5 = arith.constant 0.000000e+00 : f32
    %6 = vector.broadcast %cst_5 : f32 to vector<8x128xf32>
    %7 = arith.maximumf %5, %6 : vector<8x128xf32>
    %c0_6 = arith.constant 0 : index
    %c0_7 = arith.constant 0 : index
    %8 = vector.load %arg4[%c0_6, %c0_7] : memref<128x128xf32, #tpu.memory_space<vmem>>, vector<128x128xf32>
    %cst_8 = arith.constant dense<0.000000e+00> : vector<8x128xf32>
    %9 = tpu.matmul %7, %8, %cst_8 {dimension_numbers = #tpu.dot_dimension_numbers<[1], [0], [0], [1], [0, 0, 1, 1], [], []>} : vector<8x128xf32>, vector<128x128xf32>, vector<8x128xf32> -> vector<8x128xf32>
    %c0_9 = arith.constant 0 : index
    %c0_10 = arith.constant 0 : index
    %10 = vector.load %arg5[%c0_9, %c0_10] : memref<1x128xf32, #tpu.memory_space<vmem>>, vector<1x128xf32>
    %11 = vector.broadcast %10 : vector<1x128xf32> to vector<8x128xf32>
    %12 = arith.addf %9, %11 : vector<8x128xf32>
    %cst_11 = arith.constant 0.000000e+00 : f32
    %13 = vector.broadcast %cst_11 : f32 to vector<8x128xf32>
    %14 = arith.maximumf %12, %13 : vector<8x128xf32>
    %c0_12 = arith.constant 0 : index
    %c0_13 = arith.constant 0 : index
    %15 = vector.load %arg6[%c0_12, %c0_13] : memref<128x128xf32, #tpu.memory_space<vmem>>, vector<128x128xf32>
    %cst_14 = arith.constant dense<0.000000e+00> : vector<8x128xf32>
    %16 = tpu.matmul %14, %15, %cst_14 {dimension_numbers = #tpu.dot_dimension_numbers<[1], [0], [0], [1], [0, 0, 1, 1], [], []>} : vector<8x128xf32>, vector<128x128xf32>, vector<8x128xf32> -> vector<8x128xf32>
    %c0_15 = arith.constant 0 : index
    %c0_16 = arith.constant 0 : index
    %17 = vector.load %arg7[%c0_15, %c0_16] : memref<1x128xf32, #tpu.memory_space<vmem>>, vector<1x128xf32>
    %18 = vector.broadcast %17 : vector<1x128xf32> to vector<8x128xf32>
    %19 = arith.addf %16, %18 : vector<8x128xf32>
    %cst_17 = arith.constant 4.000000e+00 : f32
    %20 = vector.broadcast %cst_17 : f32 to vector<8x128xf32>
    %21 = arith.mulf %20, %19 : vector<8x128xf32>
    %cst_18 = arith.constant 2.000000e+01 : f32
    %22 = vector.broadcast %cst_18 : f32 to vector<8x128xf32>
    %23 = arith.cmpf ogt, %21, %22 : vector<8x128xf32>
    %cst_19 = arith.constant 2.000000e+01 : f32
    %24 = vector.broadcast %cst_19 : f32 to vector<8x128xf32>
    %25 = arith.minimumf %21, %24 : vector<8x128xf32>
    %26 = math.exp %25 : vector<8x128xf32>
    %27 = math.log1p %26 : vector<8x128xf32>
    %cst_20 = arith.constant 2.500000e-01 : f32
    %28 = vector.broadcast %cst_20 : f32 to vector<8x128xf32>
    %29 = arith.mulf %28, %27 : vector<8x128xf32>
    %30 = arith.select %23, %19, %29 : vector<8x128xi1>, vector<8x128xf32>
    %31 = tpu.iota {dimensions = array<i32: 1>} : vector<8x128xi32>
    %c4_i32 = arith.constant 4 : i32
    %32 = vector.broadcast %c4_i32 : i32 to vector<8x128xi32>
    %33 = arith.cmpi sge, %31, %32 : vector<8x128xi32>
    %c8_i32 = arith.constant 8 : i32
    %34 = vector.broadcast %c8_i32 : i32 to vector<8x128xi32>
    %35 = arith.cmpi slt, %31, %34 : vector<8x128xi32>
    %36 = arith.andi %33, %35 : vector<8x128xi1>
    %37 = arith.select %36, %30, %19 : vector<8x128xi1>, vector<8x128xf32>
    %c0_21 = arith.constant 0 : index
    %c0_22 = arith.constant 0 : index
    %38 = vector.load %arg8[%c0_21, %c0_22] : memref<8x128xf32, #tpu.memory_space<vmem>>, vector<8x128xf32>
    tpu.vector_store %arg8[%c0_21, %c0_22], %37 {strides = array<i32>} : memref<8x128xf32, #tpu.memory_space<vmem>>, vector<8x128xf32>,
    return
  }
  func.func @transform_0(%arg0: i32) -> (i32, i32) {
    %c0_i32 = arith.constant 0 : i32
    %c0_i32_0 = arith.constant 0 : i32
    return %arg0, %c0_i32 : i32, i32
  }
  func.func @transform_1(%arg0: i32) -> (i32, i32) {
    %c0_i32 = arith.constant 0 : i32
    %c0_i32_0 = arith.constant 0 : i32
    %c0_i32_1 = arith.constant 0 : i32
    return %c0_i32, %c0_i32_0 : i32, i32
  }
  func.func @transform_2(%arg0: i32) -> (i32, i32) {
    %c0_i32 = arith.constant 0 : i32
    %c0_i32_0 = arith.constant 0 : i32
    %c0_i32_1 = arith.constant 0 : i32
    return %c0_i32, %c0_i32_0 : i32, i32
  }
  func.func @transform_3(%arg0: i32) -> (i32, i32) {
    %c0_i32 = arith.constant 0 : i32
    %c0_i32_0 = arith.constant 0 : i32
    %c0_i32_1 = arith.constant 0 : i32
    return %c0_i32, %c0_i32_0 : i32, i32
  }
  func.func @transform_4(%arg0: i32) -> (i32, i32) {
    %c0_i32 = arith.constant 0 : i32
    %c0_i32_0 = arith.constant 0 : i32
    %c0_i32_1 = arith.constant 0 : i32
    return %c0_i32, %c0_i32_0 : i32, i32
  }
  func.func @transform_5(%arg0: i32) -> (i32, i32) {
    %c0_i32 = arith.constant 0 : i32
    %c0_i32_0 = arith.constant 0 : i32
    %c0_i32_1 = arith.constant 0 : i32
    return %c0_i32, %c0_i32_0 : i32, i32
  }
  func.func @transform_6(%arg0: i32) -> (i32, i32) {
    %c0_i32 = arith.constant 0 : i32
    %c0_i32_0 = arith.constant 0 : i32
    %c0_i32_1 = arith.constant 0 : i32
    return %c0_i32, %c0_i32_0 : i32, i32
  }
  func.func @transform_7(%arg0: i32) -> (i32, i32) {
    %c0_i32 = arith.constant 0 : i32
    %c0_i32_0 = arith.constant 0 : i32
    return %arg0, %c0_i32 : i32, i32
  }
}

</mosaic_0001>

<bundles_post_ra>
// kernel: tpu_custom_call.1
= control target key start
LH: loop header
LB: loop body
LE: loop exit
PB: predicated region body
PF: predicated region fallthrough
CT: control target
= control target key end

     0   :  { %12 = vsyncpa [#allocation3], 0  ;;  %s753_s0 = inlined_call_operand.hbm [shape: f32[8,16], index: 0, kind: input, shape index: {}]   ;;  %s754_s1 = inlined_call_operand.hbm [shape: f32[16,128], index: 1, kind: input, shape index: {}]   ;;  %s755_s2 = inlined_call_operand.vmem [shape: f32[1,128], index: 2, kind: input, shape index: {}]   ;;  %s756_s3 = inlined_call_operand.hbm [shape: f32[128,128], index: 3, kind: input, shape index: {}]   ;;  %s757_s4 = inlined_call_operand.vmem [shape: f32[1,128], index: 4, kind: input, shape index: {}]   ;;  %s758_s5 = inlined_call_operand.hbm [shape: f32[128,128], index: 5, kind: input, shape index: {}]   ;;  %s759_s6 = inlined_call_operand.vmem [shape: f32[1,128], index: 6, kind: input, shape index: {}]   ;;  %s760_s7 = inlined_call_operand.hbm [shape: f32[8,128], index: 7, kind: output, shape index: {}]  }
   0x1   :  { %13 = vsyncpa [#allocation6], 0 }
   0x2   :  { %14 = vsyncpa [#allocation9], 0 }
   0x3   :  { %15 = vsyncpa [#allocation4], 0  ;;  %s631_s24 = smov [#allocation5]  }
   0x4   :  { %s31_s25 = sshll.u32 %s631_s24, 4  ;;  %s32_s25 = int_to_ptr.vmem [resolvable:$true] %s31_s25 }
   0x5   :  { %s531_s26 = scalar_lea.vmem %s32_s25, 256  ;;  %p536_p1 = scmp.lt.s32.totalorder %s32_s25, %s32_s25 }
   0x6   :  { %p532_p0 = scmp.ne.s32.totalorder %s32_s25, %s531_s26  ;;  %p537_p2 = scmp.lt.s32.totalorder %s531_s26, %s531_s26 }
   0x8   :  { %p538_p3 = por %p537_p2, %p536_p1 }
   0xa   :  { %p539_p4 = pnand %p538_p3, %p532_p0 }
   0xc   :  { %542 = shalt.err (!%p539_p4)
}
   0xd   :  { %s632_s27 = smov 128   ;;  %s633_s28 = smov 8  }
   0xe   :  { %37 = dma.hbm_to_vmem [thread:$0]  %s754_s1, 256, %s32_s25, [#allocation6], %s632_s27, %s632_s27, %s633_s28  }
   0xf   :  { %s634_s8 = smov [#allocation2]   ;;  %s635_s10 = smov [#allocation7]  }
  0x10   :  { %s22_s9 = sshll.u32 %s634_s8, 4  ;;  %s45_s11 = sshll.u32 %s635_s10, 4  ;;  %s23_s9 = int_to_ptr.vmem [resolvable:$true] %s22_s9  ;;  %s46_s11 = int_to_ptr.vmem [resolvable:$true] %s45_s11 }
  0x11   :  { %s551_s12 = scalar_lea.vmem %s23_s9, 128  ;;  %p556_p6 = scmp.lt.s32.totalorder %s23_s9, %s23_s9 }
  0x12   :  { %p552_p5 = scmp.ne.s32.totalorder %s23_s9, %s551_s12  ;;  %p557_p7 = scmp.lt.s32.totalorder %s551_s12, %s551_s12 }
  0x14   :  { %p558_p8 = por %p557_p7, %p556_p6 }
  0x16   :  { %p559_p9 = pnand %p558_p8, %p552_p5 }
  0x18   :  { %562 = shalt.err (!%p559_p9)
}
  0x19   :  { %25 = dma.hbm_to_vmem [thread:$0]  %s753_s0, 128, %s23_s9, [#allocation3]  }
  0x1a   :  { %s571_s15 = scalar_lea.vmem %s46_s11, 2048  ;;  %p576_p11 = scmp.lt.s32.totalorder %s46_s11, %s46_s11 }
  0x1b   :  { %p572_p10 = scmp.ne.s32.totalorder %s46_s11, %s571_s15  ;;  %p577_p12 = scmp.lt.s32.totalorder %s571_s15, %s571_s15 }
  0x1d   :  { %p578_p13 = por %p577_p12, %p576_p11 }
  0x1f   :  { %p579_p0 = pnand %p578_p13, %p572_p10 }
  0x21   :  { %582 = shalt.err (!%p579_p0)
}
  0x22   :  { %51 = dma.hbm_to_vmem [thread:$0]  %s756_s3, 2048, %s46_s11, [#allocation6], %s632_s27, %s632_s27, %s633_s28  }
  0x23   :  { %s636_s17 = smov [#allocation8]  }
  0x24   :  { %s59_s18 = sshll.u32 %s636_s17, 4  ;;  %s60_s18 = int_to_ptr.vmem [resolvable:$true] %s59_s18 }
  0x25   :  { %s591_s19 = scalar_lea.vmem %s60_s18, 2048  ;;  %p596_p2 = scmp.lt.s32.totalorder %s60_s18, %s60_s18 }
  0x26   :  { %p592_p1 = scmp.ne.s32.totalorder %s60_s18, %s591_s19  ;;  %p597_p3 = scmp.lt.s32.totalorder %s591_s19, %s591_s19 }
  0x28   :  { %p598_p4 = por %p597_p3, %p596_p2 }
  0x2a   :  { %p599_p5 = pnand %p598_p4, %p592_p1 }
  0x2c   :  { %602 = shalt.err (!%p599_p5)
}
  0x2d   :  { %65 = dma.hbm_to_vmem [thread:$0]  %s758_s5, 2048, %s60_s18, [#allocation9], %s632_s27, %s632_s27, %s633_s28  }
  0x2e   :  { %623 = dma.done.wait [#allocation3], 128  }
  0x2f   :  { %624 = vsyncadd [#allocation3], 4294967168 }
  0x30   :  { %625 = dma.done.wait [#allocation6], 2304  }
  0x31   :  { %626 = vsyncadd [#allocation6], 4294964992 }
  0x32   :  { %627 = dma.done.wait [#allocation9], 2048  }
  0x33   :  { %628 = vsyncadd [#allocation9], 4294965248  ;;  %v637_v0 = vmov 0.0   ;;  %vm638_vm0 = vmmov 0   ;;  %v82_v1 = vld [vmem:[#allocation5 + $0x8] sm:$0xff]  ;;  %v81_v2 = vld [vmem:[#allocation5] sm:$0xff]  ;;  %v368_v56 = vlaneseq }
  0x34   :  { %433 = vmatprep.subr.mxu0 %v637_v0  ;;  %437 = vmatprep.mubr.msk.f32.mxu0 %vm638_vm0, %v637_v0  ;;  %v80_v3 = vld [vmem:[#allocation2] sm:$0xff]  ;;  %vm90_vm1 = vcmask 130048   ;;  %v180_v4 = vld [vmem:[#allocation7 + $0x78] sm:$0xff]  ;;  %v179_v5 = vld [vmem:[#allocation7 + $0x70] sm:$0xff] }
  0x35   :  { %440 = vmatprep.subr.mxu1 %v637_v0  ;;  %472 = vmatprep.mubr.msk.f32.mxu1 %vm638_vm0, %v637_v0  ;;  %v178_v6 = vld [vmem:[#allocation7 + $0x68] sm:$0xff]  ;;  %v177_v7 = vld [vmem:[#allocation7 + $0x60] sm:$0xff]  ;;  %v176_v8 = vld [vmem:[#allocation7 + $0x58] sm:$0xff]  ;;  %v369_v58 = vand.u32 127, %v368_v56 }
  0x36   :  { %434 = vmatpush3.msra.mxu0 %v82_v1  ;;  %441 = vmatpush3.msra.mxu1 %v180_v4  ;;  %v175_v9 = vld [vmem:[#allocation7 + $0x50] sm:$0xff]  ;;  %v174_v10 = vld [vmem:[#allocation7 + $0x48] sm:$0xff]  ;;  %v173_v11 = vld [vmem:[#allocation7 + $0x40] sm:$0xff] }
  0x37   :  { %435 = vmatprep.subr.mxu0 %v637_v0  ;;  %442 = vmatprep.subr.mxu1 %v637_v0  ;;  %v172_v12 = vld [vmem:[#allocation7 + $0x38] sm:$0xff]  ;;  %v171_v13 = vld [vmem:[#allocation7 + $0x30] sm:$0xff]  ;;  %v170_v14 = vld [vmem:[#allocation7 + $0x28] sm:$0xff]  ;;  %vm370_vm2 = vcmp.ge.s32.totalorder %v369_v58, 4  ;;  %vm371_vm3 = vcmp.lt.s32.totalorder %v369_v58, 8 }
  0x38   :  { %436 = vmatpush3.msra.mxu0 %v81_v2  ;;  %443 = vmatpush3.msra.mxu1 %v179_v5  ;;  %v169_v15 = vld [vmem:[#allocation7 + $0x20] sm:$0xff]  ;;  %v168_v16 = vld [vmem:[#allocation7 + $0x18] sm:$0xff]  ;;  %v167_v17 = vld [vmem:[#allocation7 + $0x10] sm:$0xff] }
  0x39   :  { %438 = vmatmul.mubr.msk.f32.vlgmr.msra.gmra.mxu0 %vm90_vm1, %v80_v3  ;;  %444 = vmatprep.subr.mxu1 %v637_v0  ;;  %v166_v18 = vld [vmem:[#allocation7 + $0x8] sm:$0xff]  ;;  %v165_v19 = vld [vmem:[#allocation7] sm:$0xff]  ;;  %v274_v20 = vld [vmem:[#allocation8 + $0x78] sm:$0xff] }
  0x3a   :  { %475 = vmatprep.subr.mxu0 %v637_v0  ;;  %445 = vmatpush3.msra.mxu1 %v178_v6  ;;  %v273_v21 = vld [vmem:[#allocation8 + $0x70] sm:$0xff]  ;;  %v272_v22 = vld [vmem:[#allocation8 + $0x68] sm:$0xff]  ;;  %v271_v23 = vld [vmem:[#allocation8 + $0x60] sm:$0xff] }
  0x3b   :  { %507 = vmatprep.mubr.msk.f32.mxu0 %vm638_vm0, %v637_v0  ;;  %446 = vmatprep.subr.mxu1 %v637_v0  ;;  %v270_v24 = vld [vmem:[#allocation8 + $0x58] sm:$0xff]  ;;  %v269_v25 = vld [vmem:[#allocation8 + $0x50] sm:$0xff]  ;;  %v268_v26 = vld [vmem:[#allocation8 + $0x48] sm:$0xff] }
  0x3c   :  { %447 = vmatpush3.msra.mxu1 %v177_v7  ;;  %476 = vmatpush3.msra.mxu0 %v274_v20  ;;  %v267_v27 = vld [vmem:[#allocation8 + $0x40] sm:$0xff]  ;;  %v266_v28 = vld [vmem:[#allocation8 + $0x38] sm:$0xff]  ;;  %v265_v29 = vld [vmem:[#allocation8 + $0x30] sm:$0xff] }
  0x3d   :  { %448 = vmatprep.subr.mxu1 %v637_v0  ;;  %477 = vmatprep.subr.mxu0 %v637_v0  ;;  %v264_v30 = vld [vmem:[#allocation8 + $0x28] sm:$0xff]  ;;  %v263_v31 = vld [vmem:[#allocation8 + $0x20] sm:$0xff]  ;;  %v262_v32 = vld [vmem:[#allocation8 + $0x18] sm:$0xff] }
  0x3e   :  { %449 = vmatpush3.msra.mxu1 %v176_v8  ;;  %478 = vmatpush3.msra.mxu0 %v273_v21  ;;  %v392_v33 = vld [vmem:[%s755_s2] ss:$0 sm:$0xff]  ;;  %v261_v38 = vld [vmem:[#allocation8 + $0x10] sm:$0xff]  ;;  %v259_v40 = vld [vmem:[#allocation8] sm:$0xff] }
  0x3f   :  { %450 = vmatprep.subr.mxu1 %v637_v0  ;;  %479 = vmatprep.subr.mxu0 %v637_v0  ;;  %v260_v39 = vld [vmem:[#allocation8 + $0x8] sm:$0xff]  ;;  %vm372_vm5 = vmand %vm370_vm2, %vm371_vm3 }
  0x40   :  { %451 = vmatpush3.msra.mxu1 %v175_v9  ;;  %480 = vmatpush3.msra.mxu0 %v272_v22  ;;  %v394_v41 = vld [vmem:[%s757_s4] ss:$0 sm:$0xff]  ;;  %s639_s4 = smov [#allocation10]  }
  0x41   :  { %452 = vmatprep.subr.mxu1 %v637_v0  ;;  %481 = vmatprep.subr.mxu0 %v637_v0  ;;  %v395_v46 = vld [vmem:[%s759_s6] ss:$0 sm:$0xff]  ;;  %s381_s6 = sshll.u32 %s639_s4, 4  ;;  %s382_s6 = int_to_ptr.vmem [resolvable:$true] %s381_s6 }
  0x42   :  { %453 = vmatpush3.msra.mxu1 %v174_v10  ;;  %482 = vmatpush3.msra.mxu0 %v271_v23  ;;  %s603_s24 = scalar_lea.vmem %s382_s6, 128  ;;  %p608_p7 = scmp.lt.s32.totalorder %s382_s6, %s382_s6 }
  0x43   :  { %454 = vmatprep.subr.mxu1 %v637_v0  ;;  %483 = vmatprep.subr.mxu0 %v637_v0  ;;  %p604_p6 = scmp.ne.s32.totalorder %s382_s6, %s603_s24  ;;  %p609_p8 = scmp.lt.s32.totalorder %s603_s24, %s603_s24 }
  0x44   :  { %455 = vmatpush3.msra.mxu1 %v173_v11  ;;  %484 = vmatpush3.msra.mxu0 %v270_v24 }
  0x45   :  { %456 = vmatprep.subr.mxu1 %v637_v0  ;;  %485 = vmatprep.subr.mxu0 %v637_v0  ;;  %p610_p9 = por %p609_p8, %p608_p7 }
  0x46   :  { %457 = vmatpush3.msra.mxu1 %v172_v12  ;;  %486 = vmatpush3.msra.mxu0 %v269_v25 }
  0x47   :  { %458 = vmatprep.subr.mxu1 %v637_v0  ;;  %487 = vmatprep.subr.mxu0 %v637_v0  ;;  %p611_p10 = pnand %p610_p9, %p604_p6 }
  0x48   :  { %459 = vmatpush3.msra.mxu1 %v171_v13  ;;  %488 = vmatpush3.msra.mxu0 %v268_v26 }
  0x49   :  { %460 = vmatprep.subr.mxu1 %v637_v0  ;;  %489 = vmatprep.subr.mxu0 %v637_v0 }
  0x4a   :  { %461 = vmatpush3.msra.mxu1 %v170_v14  ;;  %490 = vmatpush3.msra.mxu0 %v267_v27 }
  0x4b   :  { %462 = vmatprep.subr.mxu1 %v637_v0  ;;  %491 = vmatprep.subr.mxu0 %v637_v0 }
  0x4c   :  { %463 = vmatpush3.msra.mxu1 %v169_v15  ;;  %492 = vmatpush3.msra.mxu0 %v266_v28 }
  0x4d   :  { %464 = vmatprep.subr.mxu1 %v637_v0  ;;  %493 = vmatprep.subr.mxu0 %v637_v0 }
  0x4e   :  { %465 = vmatpush3.msra.mxu1 %v168_v16  ;;  %494 = vmatpush3.msra.mxu0 %v265_v29 }
  0x4f   :  { %466 = vmatprep.subr.mxu1 %v637_v0  ;;  %495 = vmatprep.subr.mxu0 %v637_v0 }
  0x50   :  { %467 = vmatpush3.msra.mxu1 %v167_v17  ;;  %496 = vmatpush3.msra.mxu0 %v264_v30 }
  0x51   :  { %468 = vmatprep.subr.mxu1 %v637_v0  ;;  %497 = vmatprep.subr.mxu0 %v637_v0 }
  0x52   :  { %469 = vmatpush3.msra.mxu1 %v166_v18  ;;  %498 = vmatpush3.msra.mxu0 %v263_v31 }
  0x53   :  { %470 = vmatprep.subr.mxu1 %v637_v0  ;;  %499 = vmatprep.subr.mxu0 %v637_v0 }
  0x54   :  { %471 = vmatpush3.msra.mxu1 %v165_v19  ;;  %500 = vmatpush3.msra.mxu0 %v262_v32 }
  0x55   :  { %501 = vmatprep.subr.mxu0 %v637_v0 }
  0x56   :  { %502 = vmatpush3.msra.mxu0 %v261_v38 }
  0x57   :  { %503 = vmatprep.subr.mxu0 %v637_v0 }
  0x58   :  { %504 = vmatpush3.msra.mxu0 %v260_v39 }
  0x59   :  { %505 = vmatprep.subr.mxu0 %v637_v0 }
  0x5a   :  { %506 = vmatpush3.msra.mxu0 %v259_v40 }
  0xf9   :  { %v160_v34 = vpop.f32.mrf.mxu0 }
  0xfa   :  { %v161_v35 = vadd.f32 %v392_v33, %v160_v34 }
  0xfb   :  { %v439_v36 = vpop.f32.mrf.mxu0 }
  0xfc   :  { %v164_v37 = vmax.f32 %v161_v35, 0.0 }
  0xfe   :  { %473 = vmatmul.mubr.f32.vlgmr.msra.gmra.mxu1 %v164_v37 }
 0x1be   :  { %v254_v42 = vpop.f32.mrf.mxu1 }
 0x1bf   :  { %v255_v43 = vadd.f32 %v394_v41, %v254_v42 }
 0x1c0   :  { %v474_v44 = vpop.f32.mrf.mxu1 }
 0x1c1   :  { %v258_v45 = vmax.f32 %v255_v43, 0.0 }
 0x1c3   :  { %508 = vmatmul.mubr.f32.vlgmr.msra.gmra.mxu0 %v258_v45 }
 0x283   :  { %v348_v47 = vpop.f32.mrf.mxu0 }
 0x284   :  { %v349_v48 = vadd.f32 %v395_v46, %v348_v47 }
 0x285   :  { %v509_v49 = vpop.f32.mrf.mxu0 }
 0x286   :  { %v352_v50 = vmul.f32 4.0, %v349_v48 }
 0x288   :  { %v354_v51 = vmin.f32 %v352_v50, 20.0  ;;  %vm353_vm6 = vcmp.gt.f32.partialorder %v352_v50, 20.0 }
 0x28a   :  { %v355_v52 = vmul.f32 1.442695, %v354_v51 }
 0x28c   :  { %519 = vpow2.f32 %v355_v52 }
 0x299   :  { %v520_v53 = vpop.eup %519 }
 0x29a   :  { %v357_v54 = vadd.f32 1.0, %v520_v53  ;;  %v360_v55 = vmul.f32 -0.5, %v520_v53  ;;  %v363_v59 = vand.u32 2147483647, %v520_v53 }
 0x29c   :  { %521 = vlog2.f32 %v357_v54  ;;  %v361_v57 = vadd.f32 1.0, %v360_v55  ;;  %vm364_vm4 = vcmp.lt.f32.partialorder %v363_v59, 0.0004427343 }
 0x29e   :  { %v362_v62 = vmul.f32 %v520_v53, %v361_v57 }
 0x2a9   :  { %v522_v60 = vpop.eup %521 }
 0x2aa   :  { %v359_v61 = vmul.f32 0.6931472, %v522_v60 }
 0x2ac   :  { %v365_v63 = vsel %vm364_vm4, %v362_v62, %v359_v61 }
 0x2ad   :  { %v366_v0 = vmul.f32 0.25, %v365_v63 }
 0x2af   :  { %v367_v1 = vsel %vm353_vm6, %v349_v48, %v366_v0 }
 0x2b0   :  { %v373_v2 = vsel %vm372_vm5, %v367_v1, %v349_v48 }
 0x2b1   :  { %374 = vst [vmem:[#allocation10] sm:$0xff] %v373_v2 }
 0x2b2   :  { %614 = shalt.err (!%p611_p10)
}
 0x2b3   :  { %384 = dma.vmem_to_hbm [thread:$0]  %s382_s6, 128, %s760_s7, [#allocation4]  }
 0x2b4   :  { %629 = dma.done.wait [#allocation4], 128  }
 0x2b5   :  { %630 = vsyncadd [#allocation4], 4294967168 }
 0x2b6   :  { %388 = vsyncpa [#allocation3], 1 }
 0x2b7   :  { %389 = vsyncpa [#allocation6], 1 }
 0x2b8   :  { %390 = vsyncpa [#allocation9], 1 }
 0x2b9   :  { %391 = vsyncpa [#allocation4], 1 }

</bundles_post_ra>
